<compile_context>
chip_gen: v6e
topology: v6e:2x2x1
jax: 0.10.0
libtpu: 0.0.40
codegen_flags: <defaults>
</compile_context>

<pallas_src>
import functools

import jax
import jax.numpy as jnp
from jax.experimental import pallas as pl
from jax.experimental.pallas import tpu as pltpu


_MAX_SINGLE_K = 4608             # single-step K reduction up to this size
_VMEM_LIMIT = 32 * 1024 * 1024   # explicit scoped-VMEM limit (v5e default 16MiB)


def _round_up(x, m):
    return ((x + m - 1) // m) * m


def _pick_row_block(ho):
    """Largest divisor of `ho` <= 32; split in two when that leaves one block
    (v7x megacore wants >= 2 parallel grid tiles)."""
    blk = ho
    for d in range(min(ho, 32), 0, -1):
        if ho % d == 0:
            blk = d
            break
    if blk == ho and ho >= 8 and ho % 2 == 0:
        blk = ho // 2
    return blk


# ----------------------------------------------------------------------------
# Pallas kernels
# ----------------------------------------------------------------------------
def _mm_kernel(*refs, nsteps, n_mult, has_res, activation):
    """out = act((A@B + bias) * prod(multipliers) + residual), f32 accumulate."""
    a_ref, b_ref, bias_ref = refs[0], refs[1], refs[2]
    pos = 3
    mult_refs = refs[pos:pos + n_mult]
    pos += n_mult
    res_ref = refs[pos] if has_res else None
    pos += 1 if has_res else 0
    o_ref = refs[pos]
    acc_ref = refs[pos + 1] if nsteps > 1 else None

    def epilogue(acc):
        r = acc + bias_ref[...]
        for m_ref in mult_refs:
            r = r * m_ref[...].astype(jnp.float32)
        if has_res:
            r = r + res_ref[...].astype(jnp.float32)
        if activation == "relu":
            r = jnp.maximum(r, 0.0)
        elif activation == "sigmoid":
            r = jax.nn.sigmoid(r)
        o_ref[...] = r.astype(o_ref.dtype)

    part = jnp.dot(a_ref[...], b_ref[...], preferred_element_type=jnp.float32)

    if nsteps == 1:
        epilogue(part)
    else:
        @pl.when(pl.program_id(2) == 0)
        def _():
            acc_ref[...] = jnp.zeros_like(acc_ref)

        acc_ref[...] += part

        @pl.when(pl.program_id(2) == nsteps - 1)
        def _():
            epilogue(acc_ref[...])


def _direct_conv_kernel(x_ref, w_ref, b_ref, *refs, KH, KW, dh, dw, Wo, row_blk,
                        n_mult, has_res, activation):
    """In-kernel tap accumulation: no im2col materialization in HBM.

    x_ref: (1, Hp, Wp, Cp) padded image; w_ref: (1, KH*KW, Cp, tn);
    b_ref: (1, 1, tn); extras: (1, row_blk, Wo, tn); out: (1, row_blk, Wo, tn).
    """
    mult_refs = refs[:n_mult]
    res_ref = refs[n_mult] if has_res else None
    o_ref = refs[n_mult + 1] if has_res else refs[n_mult]
    tn = o_ref.shape[-1]
    row_base = pl.program_id(1) * row_blk
    bias_row = b_ref[0].astype(jnp.float32)          # (1, tn)

    def body(ho, carry):
        acc = jnp.zeros((Wo, tn), jnp.float32)
        for kh in range(KH):
            for kw in range(KW):
                rr = row_base + ho + kh * dh
                xs = x_ref[0, rr, pl.ds(kw * dw, Wo), :]          # (Wo, Cp)
                acc = acc + jnp.dot(xs, w_ref[0, kh * KW + kw],
                                    preferred_element_type=jnp.float32)
        r = acc + bias_row
        for m_ref in mult_refs:
            r = r * m_ref[0, ho].astype(jnp.float32)
        if has_res:
            r = r + res_ref[0, ho].astype(jnp.float32)
        if activation == "relu":
            r = jnp.maximum(r, 0.0)
        elif activation == "sigmoid":
            r = jax.nn.sigmoid(r)
        o_ref[0, ho] = r.astype(o_ref.dtype)
        return carry

    jax.lax.fori_loop(0, row_blk, body, 0)


def _dil3_kernel(x_ref, w_ref, b_ref, o_ref, *, dilations, pmax, KH, KW, Wo,
                 row_blk):
    """Three dilated 3x3 branch convs (dil 3/5/7) of one RFB in ONE call.

    x_ref: (3, Hp, Wp, Cp) (all branches padded by pmax), w_ref: (3, 9, Cp, tn),
    b_ref: (3, 1, tn), o_ref: (3, row_blk, Wo, tn).
    """
    tn = o_ref.shape[-1]
    row_base = pl.program_id(1) * row_blk

    def body(ho, carry):
        for br, d in enumerate(dilations):
            off = pmax - d
            acc = jnp.zeros((Wo, tn), jnp.float32)
            for kh in range(KH):
                for kw in range(KW):
                    rr = row_base + ho + off + kh * d
                    xs = x_ref[br, rr, pl.ds(off + kw * d, Wo), :]
                    acc = acc + jnp.dot(xs, w_ref[br, kh * KW + kw],
                                        preferred_element_type=jnp.float32)
            r = acc + b_ref[br].astype(jnp.float32)
            o_ref[br, ho] = r.astype(o_ref.dtype)
        return carry

    jax.lax.fori_loop(0, row_blk, body, 0)


def _gate_mul_kernel(x_ref, g_ref, o_ref):
    # native bf16 multiply; g_ref is (tm, 1), broadcast across the lane axis.
    o_ref[...] = x_ref[...] * g_ref[...]


# ----------------------------------------------------------------------------
# Pallas wrappers
# ----------------------------------------------------------------------------
def matmul_bias(a, w, bias, *, multipliers=(), residual=None,
                activation="none", out_dtype=jnp.bfloat16):
    """(M,K)@(K,N) + bias[1,N] with fused multiplier / residual / activation.

    K and N are already padded to multiples of 128 (weights pre-padded at init).
    """
    M, K = a.shape
    Kw, N = w.shape
    assert Kw == K and K % 128 == 0 and N % 128 == 0, (K, N)

    tn = 256 if N % 256 == 0 else 128
    tm = min(512, _round_up(M, 16))
    Mp = _round_up(M, tm)
    # keep >= 2 grid tiles where the problem allows it (v7x has 2 TensorCores)
    if Mp // tm == 1 and N // tn == 1 and tm >= 32:
        tm = _round_up(tm // 2, 16)
        Mp = _round_up(M, tm)

    if K <= _MAX_SINGLE_K:
        tk, Kp, nsteps = K, K, 1
    else:
        tk = 512
        Kp = _round_up(K, tk)
        nsteps = Kp // tk

    a_p = a.astype(jnp.bfloat16)
    if Mp > M or Kp > K:
        a_p = jnp.pad(a_p, ((0, Mp - M), (0, Kp - K)))
    w_p = w if Kp == K else jnp.pad(w, ((0, Kp - K), (0, 0)))

    extras = [m.astype(jnp.bfloat16) for m in multipliers]
    has_res = residual is not None
    if has_res:
        extras.append(residual.astype(jnp.bfloat16))
    if Mp > M:
        extras = [jnp.pad(e, ((0, Mp - M), (0, 0))) for e in extras]

    kernel = functools.partial(_mm_kernel, nsteps=nsteps,
                               n_mult=len(multipliers), has_res=has_res,
                               activation=activation)

    if nsteps == 1:
        grid = (Mp // tm, N // tn)
        in_specs = ([pl.BlockSpec((tm, tk), lambda i, j: (i, 0)),
                     pl.BlockSpec((tk, tn), lambda i, j: (0, j)),
                     pl.BlockSpec((1, tn), lambda i, j: (0, j))]
                    + [pl.BlockSpec((tm, tn), lambda i, j: (i, j))
                       for _ in extras])
        out_spec = pl.BlockSpec((tm, tn), lambda i, j: (i, j))
        scratch = ()
        semantics = ("parallel", "parallel")
    else:
        grid = (Mp // tm, N // tn, nsteps)
        in_specs = ([pl.BlockSpec((tm, tk), lambda i, j, k: (i, k)),
                     pl.BlockSpec((tk, tn), lambda i, j, k: (k, j)),
                     pl.BlockSpec((1, tn), lambda i, j, k: (0, j))]
                    + [pl.BlockSpec((tm, tn), lambda i, j, k: (i, j))
                       for _ in extras])
        out_spec = pl.BlockSpec((tm, tn), lambda i, j, k: (i, j))
        scratch = [pltpu.VMEM((tm, tn), jnp.float32)]
        semantics = ("parallel", "parallel", "arbitrary")

    out = pl.pallas_call(
        kernel,
        out_shape=jax.ShapeDtypeStruct((Mp, N), out_dtype),
        grid=grid,
        in_specs=in_specs,
        out_specs=out_spec,
        scratch_shapes=scratch,
        compiler_params=pltpu.CompilerParams(
            dimension_semantics=semantics, vmem_limit_bytes=_VMEM_LIMIT),
    )(a_p, w_p, bias, *extras)
    return out if Mp == M else out[:M]


def conv2d_direct(x, w, b, *, padding, dilation, activation="none",
                  multipliers=(), residual=None):
    """Stride-1 conv with in-kernel tap accumulation (no im2col in HBM)."""
    B, H, W, Cp = x.shape
    KH, KW, _, Np = w.shape
    ph, pw = padding
    dh, dw = dilation
    Ho = H + 2 * ph - dh * (KH - 1)
    Wo = W + 2 * pw - dw * (KW - 1)
    xp = x if (ph == 0 and pw == 0) else jnp.pad(
        x, ((0, 0), (ph, ph), (pw, pw), (0, 0)))
    _, Hp, Wp, _ = xp.shape
    w4 = w.reshape(1, KH * KW, Cp, Np)
    b3 = b.reshape(1, 1, Np)
    extras = [m.astype(jnp.bfloat16) for m in multipliers]
    has_res = residual is not None
    if has_res:
        extras.append(residual.astype(jnp.bfloat16))

    tn = 256 if Np % 256 == 0 else 128
    row_blk = _pick_row_block(Ho)
    kernel = functools.partial(
        _direct_conv_kernel, KH=KH, KW=KW, dh=dh, dw=dw, Wo=Wo, row_blk=row_blk,
        n_mult=len(multipliers), has_res=has_res, activation=activation)

    in_specs = [
        pl.BlockSpec((1, Hp, Wp, Cp), lambda bb, r, j: (bb, 0, 0, 0)),
        pl.BlockSpec((1, KH * KW, Cp, tn), lambda bb, r, j: (0, 0, 0, j)),
        pl.BlockSpec((1, 1, tn), lambda bb, r, j: (0, 0, j)),
    ] + [pl.BlockSpec((1, row_blk, Wo, tn), lambda bb, r, j: (bb, r, 0, j))
         for _ in extras]

    return pl.pallas_call(
        kernel,
        out_shape=jax.ShapeDtypeStruct((B, Ho, Wo, Np), jnp.bfloat16),
        grid=(B, Ho // row_blk, Np // tn),
        in_specs=in_specs,
        out_specs=pl.BlockSpec((1, row_blk, Wo, tn),
                               lambda bb, r, j: (bb, r, 0, j)),
        compiler_params=pltpu.CompilerParams(
            dimension_semantics=("parallel", "parallel", "parallel"),
            vmem_limit_bytes=_VMEM_LIMIT),
    )(xp.astype(jnp.bfloat16), w4, b3, *extras)


def conv2d_im2col(x, w, b, *, stride, padding, dilation, activation="none",
                  multipliers=(), residual=None):
    """Fallback path (stride-2 audio stub, <8x8 maps): im2col + fused matmul."""
    B, H, W, C = x.shape
    KH, KW, Cp, Np = w.shape
    ph, pw = padding
    dh, dw = dilation
    s = stride
    Ho = (H + 2 * ph - dh * (KH - 1) - 1) // s + 1
    Wo = (W + 2 * pw - dw * (KW - 1) - 1) // s + 1
    xp = jnp.pad(x, ((0, 0), (ph, ph), (pw, pw), (0, 0)))
    patches = []
    for kh in range(KH):
        for kw in range(KW):
            patches.append(
                xp[:, kh * dh: kh * dh + (Ho - 1) * s + 1: s,
                   kw * dw: kw * dw + (Wo - 1) * s + 1: s, :])
    a = jnp.concatenate(patches, axis=-1).reshape(B * Ho * Wo, KH * KW * Cp)
    wm = w.reshape(KH * KW * Cp, Np)
    mult2 = tuple(m.reshape(B * Ho * Wo, Np) for m in multipliers)
    res2 = residual.reshape(B * Ho * Wo, Np) if residual is not None else None
    out = matmul_bias(a, wm, b, multipliers=mult2, residual=res2,
                      activation=activation)
    return out.reshape(B, Ho, Wo, Np)


def conv2d(x, w, b, stride=1, padding=(0, 0), dilation=(1, 1),
           activation="none", multipliers=(), residual=None):
    """x: NHWC bf16 (channels padded to 128 lanes), w: (KH,KW,Cp,Np) bf16,
    b: (1, Np) f32."""
    B, H, W, C = x.shape
    KH, KW, Cp, Np = w.shape
    assert C == Cp, (C, Cp)

    if KH == 1 and KW == 1 and stride == 1 and padding == (0, 0):
        a = x.reshape(B * H * W, Cp)
        mult2 = tuple(m.reshape(B * H * W, Np) for m in multipliers)
        res2 = residual.reshape(B * H * W, Np) if residual is not None else None
        out = matmul_bias(a, w.reshape(Cp, Np), b, multipliers=mult2,
                          residual=res2, activation=activation)
        return out.reshape(B, H, W, Np)

    ph, pw = padding
    dh, dw = dilation
    Ho = (H + 2 * ph - dh * (KH - 1) - 1) // stride + 1
    Wo = (W + 2 * pw - dw * (KW - 1) - 1) // stride + 1
    if stride == 1 and Ho >= 8 and Wo >= 8:
        return conv2d_direct(x, w, b, padding=padding, dilation=dilation,
                             activation=activation, multipliers=multipliers,
                             residual=residual)
    return conv2d_im2col(x, w, b, stride=stride, padding=padding,
                         dilation=dilation, activation=activation,
                         multipliers=multipliers, residual=residual)


def rfb_dilated3(dil_params, xs3, dilations=(3, 5, 7)):
    """The three dilated 3x3 branch convs of one RFB in a single pallas_call."""
    w_st, b_st = dil_params            # (3, 9, Cp, Np) bf16, (3, Np) f32
    B, H, W, Cp = xs3[0].shape
    Np = w_st.shape[-1]

    if H < 8 or W < 8:                 # tiny maps: im2col matmul is better
        outs = []
        for i, d in enumerate(dilations):
            w = w_st[i].reshape(3, 3, Cp, Np)
            outs.append(conv2d(xs3[i], w, b_st[i:i + 1],
                               padding=(d, d), dilation=(d, d)))
        return tuple(outs)

    pmax = max(dilations)
    Hp, Wp = H + 2 * pmax, W + 2 * pmax
    xp = jnp.stack([jnp.pad(xi, ((0, 0), (pmax, pmax), (pmax, pmax), (0, 0)))
                    for xi in xs3], axis=1).reshape(B * 3, Hp, Wp, Cp)
    tn = 256 if Np % 256 == 0 else 128
    row_blk = _pick_row_block(H)
    kernel = functools.partial(_dil3_kernel, dilations=dilations, pmax=pmax,
                               KH=3, KW=3, Wo=W, row_blk=row_blk)
    out = pl.pallas_call(
        kernel,
        out_shape=jax.ShapeDtypeStruct((B * 3, H, W, Np), jnp.bfloat16),
        grid=(B, H // row_blk, Np // tn),
        in_specs=[
            pl.BlockSpec((3, Hp, Wp, Cp), lambda bb, r, j: (bb, 0, 0, 0)),
            pl.BlockSpec((3, 9, Cp, tn), lambda bb, r, j: (0, 0, 0, j)),
            pl.BlockSpec((3, 1, tn), lambda bb, r, j: (0, 0, j)),
        ],
        out_specs=pl.BlockSpec((3, row_blk, W, tn),
                               lambda bb, r, j: (bb, r, 0, j)),
        compiler_params=pltpu.CompilerParams(
            dimension_semantics=("parallel", "parallel", "parallel"),
            vmem_limit_bytes=_VMEM_LIMIT),
    )(xp.astype(jnp.bfloat16), w_st, b_st.reshape(3, 1, Np))
    out = out.reshape(B, 3, H, W, Np)
    return out[:, 0], out[:, 1], out[:, 2]


def gate_mul(x, gate):
    """x: (B,H,W,C) bf16, gate: (B,H,W,1) -> x * gate, in-kernel broadcast."""
    B, H, W, C = x.shape
    M = B * H * W
    xm = x.reshape(M, C)
    gm = gate.reshape(M, 1).astype(x.dtype)
    tm = min(512, _round_up(M, 16))
    Mp = _round_up(M, tm)
    if Mp > M:
        xm = jnp.pad(xm, ((0, Mp - M), (0, 0)))
        gm = jnp.pad(gm, ((0, Mp - M), (0, 0)))
    out = pl.pallas_call(
        _gate_mul_kernel,
        out_shape=jax.ShapeDtypeStruct((Mp, C), x.dtype),
        grid=(Mp // tm,),
        in_specs=[pl.BlockSpec((tm, C), lambda i: (i, 0)),
                  pl.BlockSpec((tm, 1), lambda i: (i, 0))],
        out_specs=pl.BlockSpec((tm, C), lambda i: (i, 0)),
        compiler_params=pltpu.CompilerParams(
            dimension_semantics=("parallel",), vmem_limit_bytes=_VMEM_LIMIT),
    )(xm, gm)
    return out[:M].reshape(B, H, W, C)


# ----------------------------------------------------------------------------
# JAX glue: gather-free bilinear upsample (torch semantics), maxpool
# ----------------------------------------------------------------------------
def _interp_matrix(out_sz, in_sz, align_corners):
    if align_corners:
        if out_sz == 1:
            src = jnp.zeros((1,), jnp.float32)
        else:
            src = jnp.arange(out_sz, dtype=jnp.float32) * (
                (in_sz - 1) / (out_sz - 1))
    else:
        src = (jnp.arange(out_sz, dtype=jnp.float32) + 0.5) * (
            in_sz / out_sz) - 0.5
        src = jnp.clip(src, 0.0, in_sz - 1)
    i0 = jnp.floor(src).astype(jnp.int32)
    i1 = jnp.minimum(i0 + 1, in_sz - 1)
    wgt = src - i0.astype(jnp.float32)
    return (jax.nn.one_hot(i0, in_sz, dtype=jnp.float32) * (1.0 - wgt)[:, None]
            + jax.nn.one_hot(i1, in_sz, dtype=jnp.float32) * wgt[:, None])


def bilinear_upsample(x, scale, align_corners):
    # interpolation matrices have compile-time coefficients; two small einsums
    # (pure streaming, no gathers / dynamic-slices).
    B, H, W, C = x.shape
    uh = _interp_matrix(H * scale, H, align_corners)
    uw = _interp_matrix(W * scale, W, align_corners)
    y = jnp.einsum("oh,bhwc->bowc", uh, x.astype(jnp.float32))
    y = jnp.einsum("pw,bowc->bopc", uw, y)
    return y.astype(x.dtype)


def maxpool2(x):
    B, H, W, C = x.shape
    return x.reshape(B, H // 2, 2, W // 2, 2, C).max(axis=(2, 4))


# ----------------------------------------------------------------------------
# Parameters (deterministic synthetic init: conv weight ~ N(0, 0.01), bias = 0)
# Weights are stored HWIO + bf16 with 128-lane channel padding baked in.
# ----------------------------------------------------------------------------
def _key_iter(key):
    while True:
        key, sub = jax.random.split(key)
        yield sub


def conv_p(kit, cin_segs, cout_segs, kh, kw):
    """Conv params with channel padding baked in at init.

    cin_segs / cout_segs: real channel counts of the concatenated input/output
    segments; each segment lives padded to a multiple of 128 lanes in the
    activation layout, and padded weight rows/cols are zero.
    Returns (w, b): w (kh, kw, sum(cin_pad), sum(cout_pad)) bf16,
                    b (1, sum(cout_pad)) f32.
    """
    cin_pads = [_round_up(c, 128) for c in cin_segs]
    cout_pads = [_round_up(c, 128) for c in cout_segs]
    w_real = 0.01 * jax.random.normal(
        next(kit), (kh, kw, sum(cin_segs), sum(cout_segs)), jnp.float32)
    w_pad = jnp.zeros((kh, kw, sum(cin_pads), sum(cout_pads)), jnp.float32)
    ri = pi = 0
    for ci, cip in zip(cin_segs, cin_pads):
        rj = pj = 0
        for co, cop in zip(cout_segs, cout_pads):
            w_pad = w_pad.at[:, :, pi:pi + ci, pj:pj + co].set(
                w_real[:, :, ri:ri + ci, rj:rj + co])
            rj += co
            pj += cop
        ri += ci
        pi += cip
    b = jnp.zeros((1, sum(cout_pads)), jnp.float32)
    return (w_pad.astype(jnp.bfloat16), b)


def rfb_p(kit, cin, ch):
    d3 = [conv_p(kit, [ch], [ch], 3, 3) for _ in range(3)]     # dil 3/5/7
    w_dil = jnp.stack([w.reshape(9, w.shape[2], w.shape[3]) for (w, _) in d3])
    b_dil = jnp.concatenate([b for (_, b) in d3], axis=0)      # (3, Np)
    return dict(
        # b0 | b1_0 | b2_0 | b3_0 | res batched along output channels
        pre=conv_p(kit, [cin], [ch] * 5, 1, 1),
        b1_1=conv_p(kit, [ch], [ch], 1, 3),
        b1_2=conv_p(kit, [ch], [ch], 3, 1),
        b2_1=conv_p(kit, [ch], [ch], 1, 5),
        b2_2=conv_p(kit, [ch], [ch], 5, 1),
        b3_1=conv_p(kit, [ch], [ch], 1, 7),
        b3_2=conv_p(kit, [ch], [ch], 7, 1),
        dil=(w_dil, b_dil),
        cat=conv_p(kit, [ch] * 4, [ch], 3, 3),
    )


def agg_p(kit, ch):
    return dict(
        cu1=conv_p(kit, [ch], [ch], 3, 3),
        cu2=conv_p(kit, [ch], [ch], 3, 3),
        cu3=conv_p(kit, [ch], [ch], 3, 3),
        cu4=conv_p(kit, [ch], [ch], 3, 3),
        cu5=conv_p(kit, [2 * ch], [2 * ch], 3, 3),
        cc2=conv_p(kit, [ch, ch], [2 * ch], 3, 3),
        cc3=conv_p(kit, [ch, 2 * ch], [3 * ch], 3, 3),
        conv4=conv_p(kit, [3 * ch], [3 * ch], 3, 3),
        conv5=conv_p(kit, [3 * ch], [1], 1, 1),
    )


def init_params(key, channel=32):
    kit = _key_iter(key)
    p = {}
    # TODO(synk): torchvision resnet18 audio backbone not reproducible here;
    # stubbed with a 5-stage stride-2 conv pyramid -> (128,/8),(256,/16),(512,/32).
    audio_ch = [(3, 64), (64, 64), (64, 128), (128, 256), (256, 512)]
    p["audio"] = [conv_p(kit, [ci], [co], 3, 3) for ci, co in audio_ch]
    # TODO(synk): Video_Audio_Con structure unknown; conv_3/4/5 stubbed as 1x1 convs.
    p["va_conv3"] = conv_p(kit, [128], [256], 1, 1)
    p["va_conv4"] = conv_p(kit, [256], [512], 1, 1)
    p["va_conv5"] = conv_p(kit, [512], [512], 1, 1)
    p["rfb3_1"] = rfb_p(kit, 256, channel)
    p["rfb4_1"] = rfb_p(kit, 512, channel)
    p["rfb5_1"] = rfb_p(kit, 512, channel)
    p["agg1"] = agg_p(kit, channel)
    # TODO(synk): B2_VGG conv4_2/conv5_2 blocks stubbed as maxpool + single 3x3 conv+ReLU.
    p["vgg4_2"] = conv_p(kit, [256], [512], 3, 3)
    p["vgg5_2"] = conv_p(kit, [512], [512], 3, 3)
    p["rfb3_2"] = rfb_p(kit, 256, channel)
    p["rfb4_2"] = rfb_p(kit, 512, channel)
    p["rfb5_2"] = rfb_p(kit, 512, channel)
    p["agg2"] = agg_p(kit, channel)
    return p


# ----------------------------------------------------------------------------
# Module forwards (exact RFB / aggregation semantics, 128-lane padded layout)
# ----------------------------------------------------------------------------
def rfb_forward(p, x):
    seg = p["b1_1"][0].shape[2]                 # padded branch width (128)
    pre = conv2d(x, *p["pre"])                  # 5 parallel 1x1 convs, 1 matmul
    x0 = pre[..., 0 * seg:1 * seg]
    x1 = pre[..., 1 * seg:2 * seg]
    x2 = pre[..., 2 * seg:3 * seg]
    x3 = pre[..., 3 * seg:4 * seg]
    x_res = pre[..., 4 * seg:5 * seg]
    x1 = conv2d(x1, *p["b1_1"], padding=(0, 1))
    x1 = conv2d(x1, *p["b1_2"], padding=(1, 0))
    x2 = conv2d(x2, *p["b2_1"], padding=(0, 2))
    x2 = conv2d(x2, *p["b2_2"], padding=(2, 0))
    x3 = conv2d(x3, *p["b3_1"], padding=(0, 3))
    x3 = conv2d(x3, *p["b3_2"], padding=(3, 0))
    x1, x2, x3 = rfb_dilated3(p["dil"], (x1, x2, x3))
    x_cat = jnp.concatenate([x0, x1, x2, x3], axis=-1)
    # residual add + ReLU fused into the cat-conv epilogue
    return conv2d(x_cat, *p["cat"], padding=(1, 1),
                  residual=x_res, activation="relu")


def agg_forward(p, x1, x2, x3, final_activation="none"):
    up = lambda t: bilinear_upsample(t, 2, align_corners=True)
    x1u = up(x1)
    x1uu = up(x1u)
    x2u = up(x2)
    # x2_1 = cu1(up(x1)) * x2              (multiply fused into epilogue)
    x2_1 = conv2d(x1u, *p["cu1"], padding=(1, 1), multipliers=(x2,))
    # x3_1 = cu2(up(up(x1))) * cu3(up(x2)) * x3
    c2 = conv2d(x1uu, *p["cu2"], padding=(1, 1))
    x3_1 = conv2d(x2u, *p["cu3"], padding=(1, 1), multipliers=(c2, x3))
    x2_2 = jnp.concatenate(
        [x2_1, conv2d(x1u, *p["cu4"], padding=(1, 1))], axis=-1)
    x2_2 = conv2d(x2_2, *p["cc2"], padding=(1, 1))
    x3_2 = jnp.concatenate(
        [x3_1, conv2d(up(x2_2), *p["cu5"], padding=(1, 1))], axis=-1)
    x3_2 = conv2d(x3_2, *p["cc3"], padding=(1, 1))
    x = conv2d(x3_2, *p["conv4"], padding=(1, 1))
    x = conv2d(x, *p["conv5"], activation=final_activation)
    return x


@jax.jit
def cpd_forward(params, a_nchw):
    # layout: PyTorch NCHW input -> NHWC bf16 with channels padded to 128 lanes.
    x = jnp.transpose(a_nchw, (0, 2, 3, 1)).astype(jnp.bfloat16)
    cpad = _round_up(x.shape[-1], 128) - x.shape[-1]
    x = jnp.pad(x, ((0, 0), (0, 0), (0, 0), (0, cpad)))

    # audio_branch stub -> (a1, a2, a3) feature pyramid (im2col path: stride 2)
    h = x
    feats = []
    for (w, b) in params["audio"]:
        h = conv2d(h, w, b, stride=2, padding=(1, 1), activation="relu")
        feats.append(h)
    a1, a2, a3 = feats[2], feats[3], feats[4]

    a1 = bilinear_upsample(a1, 2, align_corners=False)
    a2 = bilinear_upsample(a2, 2, align_corners=False)
    a3 = bilinear_upsample(a3, 2, align_corners=False)

    x3_1 = conv2d(a1, *params["va_conv3"])
    x4_1 = conv2d(a2, *params["va_conv4"])
    x5_1 = conv2d(a3, *params["va_conv5"])

    xx = x3_1
    x3_1 = rfb_forward(params["rfb3_1"], x3_1)
    x4_1 = rfb_forward(params["rfb4_1"], x4_1)
    x5_1 = rfb_forward(params["rfb5_1"], x5_1)
    # sigmoid fused into agg1's conv5 epilogue
    att = agg_forward(params["agg1"], x5_1, x4_1, x3_1,
                      final_activation="sigmoid")

    # TODO(synk): HA (holistic attention, gaussian-blur refinement) not provided;
    # simplified to a channel-broadcast gated multiply (broadcast done in-kernel).
    x3_2 = gate_mul(xx, att[..., :1])

    x4_2 = conv2d(maxpool2(x3_2), *params["vgg4_2"], padding=(1, 1),
                  activation="relu")
    x5_2 = conv2d(maxpool2(x4_2), *params["vgg5_2"], padding=(1, 1),
                  activation="relu")

    x3_2r = rfb_forward(params["rfb3_2"], x3_2)
    x4_2r = rfb_forward(params["rfb4_2"], x4_2)
    x5_2r = rfb_forward(params["rfb5_2"], x5_2)
    detection = agg_forward(params["agg2"], x5_2r, x4_2r, x3_2r)

    det = detection[..., :1].astype(jnp.float32)
    out = bilinear_upsample(det, 4, align_corners=False)
    return jnp.transpose(out, (0, 3, 1, 2))        # back to NCHW, f32


# ----------------------------------------------------------------------------
# numerical self-check of the direct / batched conv kernels vs lax.conv
# ----------------------------------------------------------------------------
def _selfcheck():
    k = jax.random.PRNGKey(123)
    kx, kw, k1, k2, k3 = jax.random.split(k, 5)
    x = jax.random.normal(kx, (1, 16, 16, 128), jnp.float32).astype(jnp.bfloat16)
    w = (0.05 * jax.random.normal(kw, (3, 3, 128, 128), jnp.float32)
         ).astype(jnp.bfloat16)
    b = jnp.zeros((1, 128), jnp.float32)
    out = conv2d(x, w, b, padding=(3, 3), dilation=(3, 3))
    ref = jax.lax.conv_general_dilated(
        x.astype(jnp.float32), w.astype(jnp.float32), (1, 1),
        ((3, 3), (3, 3)), rhs_dilation=(3, 3),
        dimension_numbers=("NHWC", "HWIO", "NHWC"),
        precision=jax.lax.Precision.HIGHEST)
    err = float(jnp.max(jnp.abs(out.astype(jnp.float32) - ref)))
    scale = float(jnp.max(jnp.abs(ref))) + 1e-6
    assert err <= 0.05 * scale, ("direct conv mismatch", err, scale)

    xs = tuple(jax.random.normal(kk, (1, 16, 16, 128), jnp.float32
                                 ).astype(jnp.bfloat16) for kk in (k1, k2, k3))
    ws = [(0.05 * jax.random.normal(jax.random.fold_in(kw, i),
                                    (3, 3, 128, 128), jnp.float32)
           ).astype(jnp.bfloat16) for i in range(3)]
    w_st = jnp.stack([wi.reshape(9, 128, 128) for wi in ws])
    b_st = jnp.zeros((3, 128), jnp.float32)
    outs = rfb_dilated3((w_st, b_st), xs)
    for i, d in enumerate((3, 5, 7)):
        ref = jax.lax.conv_general_dilated(
            xs[i].astype(jnp.float32), ws[i].astype(jnp.float32), (1, 1),
            ((d, d), (d, d)), rhs_dilation=(d, d),
            dimension_numbers=("NHWC", "HWIO", "NHWC"),
            precision=jax.lax.Precision.HIGHEST)
        err = float(jnp.max(jnp.abs(outs[i].astype(jnp.float32) - ref)))
        scale = float(jnp.max(jnp.abs(ref))) + 1e-6
        assert err <= 0.05 * scale, ("dilated batched mismatch", i, err, scale)


if __name__ == "__main__":
    _selfcheck()
    key = jax.random.PRNGKey(0)
    pkey, xkey = jax.random.split(key)
    params = init_params(pkey, channel=32)
    a = jax.random.normal(xkey, (1, 3, 64, 64), jnp.float32)  # NCHW input
    out = cpd_forward(params, a)
    out = jax.block_until_ready(out)
    assert out.shape == (1, 1, 64, 64), out.shape
    assert bool(jnp.all(jnp.isfinite(out)))
    print("KERNEL_OK")
</pallas_src>

<mosaic_0001>
module attributes {stable_mosaic.version = 11 : i64} {
  func.func @_direct_conv_kernel(%arg0: i32, %arg1: i32, %arg2: i32, %arg3: memref<1x22x22x128xbf16, #tpu.memory_space<vmem>>, %arg4: memref<1x9x128x128xbf16, #tpu.memory_space<vmem>>, %arg5: memref<1x1x128xf32, #tpu.memory_space<vmem>>, %arg6: memref<1x8x16x128xbf16, #tpu.memory_space<vmem>>) attributes {dimension_semantics = [#tpu.dimension_semantics<parallel>, #tpu.dimension_semantics<parallel>, #tpu.dimension_semantics<parallel>], iteration_bounds = array<i64: 1, 2, 1>, scalar_prefetch = 0 : i64, scratch_operands = 0 : i64, tpu.core_type = #tpu.core_type<tc>, window_params = [{transform_indices = @transform_0, window_bounds = array<i64: 1, 22, 22, 128>}, {transform_indices = @transform_1, window_bounds = array<i64: 1, 9, 128, 128>}, {transform_indices = @transform_2, window_bounds = array<i64: 1, 1, 128>}, {transform_indices = @transform_3, window_bounds = array<i64: 1, 8, 16, 128>}]} {
    %c8_i32 = arith.constant 8 : i32
    %0 = arith.muli %arg1, %c8_i32 : i32
    %c0 = arith.constant 0 : index
    %c0_0 = arith.constant 0 : index
    %c0_1 = arith.constant 0 : index
    %1 = vector.load %arg5[%c0, %c0_0, %c0_1] : memref<1x1x128xf32, #tpu.memory_space<vmem>>, vector<1x1x128xf32>
    %2 = vector.shape_cast %1 : vector<1x1x128xf32> to vector<1x128xf32>
    %c0_i32 = arith.constant 0 : i32
    %c8_i32_2 = arith.constant 8 : i32
    %3 = arith.addi %c0_i32, %c8_i32_2 : i32
    %c1_i32 = arith.constant 1 : i32
    scf.for %arg7 = %c0_i32 to %3 step %c1_i32  : i32 {
      %cst = arith.constant 0.000000e+00 : f32
      %4 = vector.broadcast %cst : f32 to vector<16x128xf32>
      %5 = arith.addi %0, %arg7 : i32
      %c0_i32_4 = arith.constant 0 : i32
      %6 = arith.addi %5, %c0_i32_4 : i32
      %c0_5 = arith.constant 0 : index
      %7 = arith.index_cast %6 : i32 to index
      %c0_6 = arith.constant 0 : index
      %c0_7 = arith.constant 0 : index
      %8 = vector.load %arg3[%c0_5, %7, %c0_6, %c0_7] : memref<1x22x22x128xbf16, #tpu.memory_space<vmem>>, vector<1x1x16x128xbf16>
      %9 = vector.shape_cast %8 : vector<1x1x16x128xbf16> to vector<16x128xbf16>
      %c0_8 = arith.constant 0 : index
      %c0_9 = arith.constant 0 : index
      %c0_10 = arith.constant 0 : index
      %c0_11 = arith.constant 0 : index
      %10 = vector.load %arg4[%c0_8, %c0_9, %c0_10, %c0_11] : memref<1x9x128x128xbf16, #tpu.memory_space<vmem>>, vector<1x1x128x128xbf16>
      %11 = vector.shape_cast %10 : vector<1x1x128x128xbf16> to vector<128x128xbf16>
      %cst_12 = arith.constant dense<0.000000e+00> : vector<16x128xf32>
      %12 = tpu.matmul %9, %11, %cst_12 {dimension_numbers = #tpu.dot_dimension_numbers<[1], [0], [0], [1], [0, 0, 1, 1], [], []>} : vector<16x128xbf16>, vector<128x128xbf16>, vector<16x128xf32> -> vector<16x128xf32>
      %13 = arith.addf %4, %12 : vector<16x128xf32>
      %14 = arith.addi %0, %arg7 : i32
      %c0_i32_13 = arith.constant 0 : i32
      %15 = arith.addi %14, %c0_i32_13 : i32
      %c0_14 = arith.constant 0 : index
      %16 = arith.index_cast %15 : i32 to index
      %c3 = arith.constant 3 : index
      %c0_15 = arith.constant 0 : index
      %17 = vector.load %arg3[%c0_14, %16, %c3, %c0_15] : memref<1x22x22x128xbf16, #tpu.memory_space<vmem>>, vector<1x1x16x128xbf16>
      %18 = vector.shape_cast %17 : vector<1x1x16x128xbf16> to vector<16x128xbf16>
      %c0_16 = arith.constant 0 : index
      %c1 = arith.constant 1 : index
      %c0_17 = arith.constant 0 : index
      %c0_18 = arith.constant 0 : index
      %19 = vector.load %arg4[%c0_16, %c1, %c0_17, %c0_18] : memref<1x9x128x128xbf16, #tpu.memory_space<vmem>>, vector<1x1x128x128xbf16>
      %20 = vector.shape_cast %19 : vector<1x1x128x128xbf16> to vector<128x128xbf16>
      %cst_19 = arith.constant dense<0.000000e+00> : vector<16x128xf32>
      %21 = tpu.matmul %18, %20, %cst_19 {dimension_numbers = #tpu.dot_dimension_numbers<[1], [0], [0], [1], [0, 0, 1, 1], [], []>} : vector<16x128xbf16>, vector<128x128xbf16>, vector<16x128xf32> -> vector<16x128xf32>
      %22 = arith.addf %13, %21 : vector<16x128xf32>
      %23 = arith.addi %0, %arg7 : i32
      %c0_i32_20 = arith.constant 0 : i32
      %24 = arith.addi %23, %c0_i32_20 : i32
      %c0_21 = arith.constant 0 : index
      %25 = arith.index_cast %24 : i32 to index
      %c6 = arith.constant 6 : index
      %c0_22 = arith.constant 0 : index
      %26 = vector.load %arg3[%c0_21, %25, %c6, %c0_22] : memref<1x22x22x128xbf16, #tpu.memory_space<vmem>>, vector<1x1x16x128xbf16>
      %27 = vector.shape_cast %26 : vector<1x1x16x128xbf16> to vector<16x128xbf16>
      %c0_23 = arith.constant 0 : index
      %c2 = arith.constant 2 : index
      %c0_24 = arith.constant 0 : index
      %c0_25 = arith.constant 0 : index
      %28 = vector.load %arg4[%c0_23, %c2, %c0_24, %c0_25] : memref<1x9x128x128xbf16, #tpu.memory_space<vmem>>, vector<1x1x128x128xbf16>
      %29 = vector.shape_cast %28 : vector<1x1x128x128xbf16> to vector<128x128xbf16>
      %cst_26 = arith.constant dense<0.000000e+00> : vector<16x128xf32>
      %30 = tpu.matmul %27, %29, %cst_26 {dimension_numbers = #tpu.dot_dimension_numbers<[1], [0], [0], [1], [0, 0, 1, 1], [], []>} : vector<16x128xbf16>, vector<128x128xbf16>, vector<16x128xf32> -> vector<16x128xf32>
      %31 = arith.addf %22, %30 : vector<16x128xf32>
      %32 = arith.addi %0, %arg7 : i32
      %c3_i32 = arith.constant 3 : i32
      %33 = arith.addi %32, %c3_i32 : i32
      %c0_27 = arith.constant 0 : index
      %34 = arith.index_cast %33 : i32 to index
      %c0_28 = arith.constant 0 : index
      %c0_29 = arith.constant 0 : index
      %35 = vector.load %arg3[%c0_27, %34, %c0_28, %c0_29] : memref<1x22x22x128xbf16, #tpu.memory_space<vmem>>, vector<1x1x16x128xbf16>
      %36 = vector.shape_cast %35 : vector<1x1x16x128xbf16> to vector<16x128xbf16>
      %c0_30 = arith.constant 0 : index
      %c3_31 = arith.constant 3 : index
      %c0_32 = arith.constant 0 : index
      %c0_33 = arith.constant 0 : index
      %37 = vector.load %arg4[%c0_30, %c3_31, %c0_32, %c0_33] : memref<1x9x128x128xbf16, #tpu.memory_space<vmem>>, vector<1x1x128x128xbf16>
      %38 = vector.shape_cast %37 : vector<1x1x128x128xbf16> to vector<128x128xbf16>
      %cst_34 = arith.constant dense<0.000000e+00> : vector<16x128xf32>
      %39 = tpu.matmul %36, %38, %cst_34 {dimension_numbers = #tpu.dot_dimension_numbers<[1], [0], [0], [1], [0, 0, 1, 1], [], []>} : vector<16x128xbf16>, vector<128x128xbf16>, vector<16x128xf32> -> vector<16x128xf32>
      %40 = arith.addf %31, %39 : vector<16x128xf32>
      %41 = arith.addi %0, %arg7 : i32
      %c3_i32_35 = arith.constant 3 : i32
      %42 = arith.addi %41, %c3_i32_35 : i32
      %c0_36 = arith.constant 0 : index
      %43 = arith.index_cast %42 : i32 to index
      %c3_37 = arith.constant 3 : index
      %c0_38 = arith.constant 0 : index
      %44 = vector.load %arg3[%c0_36, %43, %c3_37, %c0_38] : memref<1x22x22x128xbf16, #tpu.memory_space<vmem>>, vector<1x1x16x128xbf16>
      %45 = vector.shape_cast %44 : vector<1x1x16x128xbf16> to vector<16x128xbf16>
      %c0_39 = arith.constant 0 : index
      %c4 = arith.constant 4 : index
      %c0_40 = arith.constant 0 : index
      %c0_41 = arith.constant 0 : index
      %46 = vector.load %arg4[%c0_39, %c4, %c0_40, %c0_41] : memref<1x9x128x128xbf16, #tpu.memory_space<vmem>>, vector<1x1x128x128xbf16>
      %47 = vector.shape_cast %46 : vector<1x1x128x128xbf16> to vector<128x128xbf16>
      %cst_42 = arith.constant dense<0.000000e+00> : vector<16x128xf32>
      %48 = tpu.matmul %45, %47, %cst_42 {dimension_numbers = #tpu.dot_dimension_numbers<[1], [0], [0], [1], [0, 0, 1, 1], [], []>} : vector<16x128xbf16>, vector<128x128xbf16>, vector<16x128xf32> -> vector<16x128xf32>
      %49 = arith.addf %40, %48 : vector<16x128xf32>
      %50 = arith.addi %0, %arg7 : i32
      %c3_i32_43 = arith.constant 3 : i32
      %51 = arith.addi %50, %c3_i32_43 : i32
      %c0_44 = arith.constant 0 : index
      %52 = arith.index_cast %51 : i32 to index
      %c6_45 = arith.constant 6 : index
      %c0_46 = arith.constant 0 : index
      %53 = vector.load %arg3[%c0_44, %52, %c6_45, %c0_46] : memref<1x22x22x128xbf16, #tpu.memory_space<vmem>>, vector<1x1x16x128xbf16>
      %54 = vector.shape_cast %53 : vector<1x1x16x128xbf16> to vector<16x128xbf16>
      %c0_47 = arith.constant 0 : index
      %c5 = arith.constant 5 : index
      %c0_48 = arith.constant 0 : index
      %c0_49 = arith.constant 0 : index
      %55 = vector.load %arg4[%c0_47, %c5, %c0_48, %c0_49] : memref<1x9x128x128xbf16, #tpu.memory_space<vmem>>, vector<1x1x128x128xbf16>
      %56 = vector.shape_cast %55 : vector<1x1x128x128xbf16> to vector<128x128xbf16>
      %cst_50 = arith.constant dense<0.000000e+00> : vector<16x128xf32>
      %57 = tpu.matmul %54, %56, %cst_50 {dimension_numbers = #tpu.dot_dimension_numbers<[1], [0], [0], [1], [0, 0, 1, 1], [], []>} : vector<16x128xbf16>, vector<128x128xbf16>, vector<16x128xf32> -> vector<16x128xf32>
      %58 = arith.addf %49, %57 : vector<16x128xf32>
      %59 = arith.addi %0, %arg7 : i32
      %c6_i32 = arith.constant 6 : i32
      %60 = arith.addi %59, %c6_i32 : i32
      %c0_51 = arith.constant 0 : index
      %61 = arith.index_cast %60 : i32 to index
      %c0_52 = arith.constant 0 : index
      %c0_53 = arith.constant 0 : index
      %62 = vector.load %arg3[%c0_51, %61, %c0_52, %c0_53] : memref<1x22x22x128xbf16, #tpu.memory_space<vmem>>, vector<1x1x16x128xbf16>
      %63 = vector.shape_cast %62 : vector<1x1x16x128xbf16> to vector<16x128xbf16>
      %c0_54 = arith.constant 0 : index
      %c6_55 = arith.constant 6 : index
      %c0_56 = arith.constant 0 : index
      %c0_57 = arith.constant 0 : index
      %64 = vector.load %arg4[%c0_54, %c6_55, %c0_56, %c0_57] : memref<1x9x128x128xbf16, #tpu.memory_space<vmem>>, vector<1x1x128x128xbf16>
      %65 = vector.shape_cast %64 : vector<1x1x128x128xbf16> to vector<128x128xbf16>
      %cst_58 = arith.constant dense<0.000000e+00> : vector<16x128xf32>
      %66 = tpu.matmul %63, %65, %cst_58 {dimension_numbers = #tpu.dot_dimension_numbers<[1], [0], [0], [1], [0, 0, 1, 1], [], []>} : vector<16x128xbf16>, vector<128x128xbf16>, vector<16x128xf32> -> vector<16x128xf32>
      %67 = arith.addf %58, %66 : vector<16x128xf32>
      %68 = arith.addi %0, %arg7 : i32
      %c6_i32_59 = arith.constant 6 : i32
      %69 = arith.addi %68, %c6_i32_59 : i32
      %c0_60 = arith.constant 0 : index
      %70 = arith.index_cast %69 : i32 to index
      %c3_61 = arith.constant 3 : index
      %c0_62 = arith.constant 0 : index
      %71 = vector.load %arg3[%c0_60, %70, %c3_61, %c0_62] : memref<1x22x22x128xbf16, #tpu.memory_space<vmem>>, vector<1x1x16x128xbf16>
      %72 = vector.shape_cast %71 : vector<1x1x16x128xbf16> to vector<16x128xbf16>
      %c0_63 = arith.constant 0 : index
      %c7 = arith.constant 7 : index
      %c0_64 = arith.constant 0 : index
      %c0_65 = arith.constant 0 : index
      %73 = vector.load %arg4[%c0_63, %c7, %c0_64, %c0_65] : memref<1x9x128x128xbf16, #tpu.memory_space<vmem>>, vector<1x1x128x128xbf16>
      %74 = vector.shape_cast %73 : vector<1x1x128x128xbf16> to vector<128x128xbf16>
      %cst_66 = arith.constant dense<0.000000e+00> : vector<16x128xf32>
      %75 = tpu.matmul %72, %74, %cst_66 {dimension_numbers = #tpu.dot_dimension_numbers<[1], [0], [0], [1], [0, 0, 1, 1], [], []>} : vector<16x128xbf16>, vector<128x128xbf16>, vector<16x128xf32> -> vector<16x128xf32>
      %76 = arith.addf %67, %75 : vector<16x128xf32>
      %77 = arith.addi %0, %arg7 : i32
      %c6_i32_67 = arith.constant 6 : i32
      %78 = arith.addi %77, %c6_i32_67 : i32
      %c0_68 = arith.constant 0 : index
      %79 = arith.index_cast %78 : i32 to index
      %c6_69 = arith.constant 6 : index
      %c0_70 = arith.constant 0 : index
      %80 = vector.load %arg3[%c0_68, %79, %c6_69, %c0_70] : memref<1x22x22x128xbf16, #tpu.memory_space<vmem>>, vector<1x1x16x128xbf16>
      %81 = vector.shape_cast %80 : vector<1x1x16x128xbf16> to vector<16x128xbf16>
      %c0_71 = arith.constant 0 : index
      %c8 = arith.constant 8 : index
      %c0_72 = arith.constant 0 : index
      %c0_73 = arith.constant 0 : index
      %82 = vector.load %arg4[%c0_71, %c8, %c0_72, %c0_73] : memref<1x9x128x128xbf16, #tpu.memory_space<vmem>>, vector<1x1x128x128xbf16>
      %83 = vector.shape_cast %82 : vector<1x1x128x128xbf16> to vector<128x128xbf16>
      %cst_74 = arith.constant dense<0.000000e+00> : vector<16x128xf32>
      %84 = tpu.matmul %81, %83, %cst_74 {dimension_numbers = #tpu.dot_dimension_numbers<[1], [0], [0], [1], [0, 0, 1, 1], [], []>} : vector<16x128xbf16>, vector<128x128xbf16>, vector<16x128xf32> -> vector<16x128xf32>
      %85 = arith.addf %76, %84 : vector<16x128xf32>
      %86 = vector.broadcast %2 : vector<1x128xf32> to vector<16x128xf32>
      %87 = arith.addf %85, %86 : vector<16x128xf32>
      %88 = arith.truncf %87 : vector<16x128xf32> to vector<16x128xbf16>
      %c0_75 = arith.constant 0 : index
      %89 = arith.index_cast %arg7 : i32 to index
      %c0_76 = arith.constant 0 : index
      %c0_77 = arith.constant 0 : index
      %90 = vector.load %arg6[%c0_75, %89, %c0_76, %c0_77] : memref<1x8x16x128xbf16, #tpu.memory_space<vmem>>, vector<1x1x16x128xbf16>
      %91 = vector.shape_cast %90 : vector<1x1x16x128xbf16> to vector<16x128xbf16>
      %92 = vector.shape_cast %88 : vector<16x128xbf16> to vector<1x1x16x128xbf16>
      tpu.vector_store %arg6[%c0_75, %89, %c0_76, %c0_77], %92 {strides = array<i32>} : memref<1x8x16x128xbf16, #tpu.memory_space<vmem>>, vector<1x1x16x128xbf16>,
    }
    %c8_i32_3 = arith.constant 8 : i32
    return
  }
  func.func @transform_0(%arg0: i32, %arg1: i32, %arg2: i32) -> (i32, i32, i32, i32) {
    %c0_i32 = arith.constant 0 : i32
    %c0_i32_0 = arith.constant 0 : i32
    %c0_i32_1 = arith.constant 0 : i32
    %c0_i32_2 = arith.constant 0 : i32
    return %arg0, %c0_i32, %c0_i32_0, %c0_i32_1 : i32, i32, i32, i32
  }
  func.func @transform_1(%arg0: i32, %arg1: i32, %arg2: i32) -> (i32, i32, i32, i32) {
    %c0_i32 = arith.constant 0 : i32
    %c0_i32_0 = arith.constant 0 : i32
    %c0_i32_1 = arith.constant 0 : i32
    %c0_i32_2 = arith.constant 0 : i32
    return %c0_i32, %c0_i32_0, %c0_i32_1, %arg2 : i32, i32, i32, i32
  }
  func.func @transform_2(%arg0: i32, %arg1: i32, %arg2: i32) -> (i32, i32, i32) {
    %c0_i32 = arith.constant 0 : i32
    %c0_i32_0 = arith.constant 0 : i32
    %c0_i32_1 = arith.constant 0 : i32
    return %c0_i32, %c0_i32_0, %arg2 : i32, i32, i32
  }
  func.func @transform_3(%arg0: i32, %arg1: i32, %arg2: i32) -> (i32, i32, i32, i32) {
    %c0_i32 = arith.constant 0 : i32
    %c0_i32_0 = arith.constant 0 : i32
    return %arg0, %arg1, %c0_i32, %arg2 : i32, i32, i32, i32
  }
}

</mosaic_0001>

<bundles_post_ra>
// kernel: tpu_custom_call.1
= control target key start
LH: loop header
LB: loop body
LE: loop exit
PB: predicated region body
PF: predicated region fallthrough
CT: control target
= control target key end

     0   :  { %8 = vsyncpa [#allocation3], 0  ;;  %s2588_s0 = inlined_call_operand.hbm [shape: bf16[1,22,22,128], index: 0, kind: input, shape index: {}]   ;;  %s2589_s1 = inlined_call_operand.hbm [shape: bf16[1,9,128,128], index: 1, kind: input, shape index: {}]   ;;  %s2590_s2 = inlined_call_operand.vmem [shape: f32[1,1,128], index: 2, kind: input, shape index: {}]   ;;  %s2591_s3 = inlined_call_operand.hbm [shape: bf16[1,16,16,128], index: 3, kind: output, shape index: {}]  }
   0x1   :  { %9 = vsyncpa [#allocation6], 0 }
   0x2   :  { %10 = vsyncpa [#allocation4], 0 }
   0x3   :  { %12 = vsyncpa [#allocation4 + $0x1], 0  ;;  %s2279_s12 = smov 0   ;;  %s2281_s13 = smov 0  }
   0x4   :  { %s2283_s14 = smov 0   ;;  %s2285_s15 = smov 0  }
   0x5   :  { %s2287_s16 = smov 0   ;;  %s2289_s17 = smov 0  }
   0x6 LB: > { %s1529_s18 = sadd.s32 4294967295, %s2244_s17   ;;  %s1530_s19 = sadd.s32 4294967294, %s2244_s17   ;;  %s2244_s17 = sphi %s2289_s17, %s18_s17   ;;  %s2240_s16 = sphi %s2287_s16, %s2604_s16   ;;  %s2236_s15 = sphi %s2285_s15, %s2603_s15   ;;  %s2232_s14 = sphi %s2283_s14, %s2602_s14   ;;  %s2228_s13 = sphi %s2281_s13, %s2601_s13   ;;  %s2224_s12 = sphi %s2279_s12, %s2600_s12  }
   0x7   : > { %s33_s20 = sadd.s32 1, %s2240_s16  ;;  %s126_s21 = sadd.s32 1, %s2232_s14 }
   0x8   : > { %p35_p0 = scmp.ge.s32.totalorder %s33_s20, 2  ;;  %p136_p1 = scmp.ne.s32.totalorder %s2232_s14, %s2228_s13 }
   0x9   : > { %p137_p2 = scmp.eq.s32.totalorder %s1529_s18, 1  ;;  %p142_p3 = scmp.ne.s32.totalorder %s2228_s13, %s2224_s12 }
   0xa   : > { %s2606_s20 = smov (%p35_p0, %s33_s20), 0  ;;  %p143_p5 = scmp.eq.s32.totalorder %s1530_s19, 1 }
   0xb   : > { %p2319_p4 = por %p137_p2, %p136_p1  ;;  %s120_s23 = ssub.s32 %s2240_s16, %s2606_s20 }
   0xc   : > { %p1531_p6 = scmp.ge.s32.totalorder %s2244_s17, 1  ;;  %p124_p7 = scmp.eq.s32.totalorder %s120_s23, 0 }
   0xd   : > { %s2593_s22 = scalar_select %p2319_p4, 1, 0 }
   0xe   : > { %p2326_p8 = por %p143_p5, %p142_p3  ;;  %p150_p9 = scmp.lt.s32.totalorder %s2244_s17, 3 }
   0xf   : > { %s2332_s25 = scalar_select %p124_p7, %s2232_s14, %s126_s21  }
  0x10   : > { %s2594_s24 = scalar_select %p2326_p8, 1, 0 }
  0x11   : > { %p2334_p10 = pnand %p1531_p6, %p150_p9  ;;  %p2338_p11 = scmp.eq.s32.totalorder %s1529_s18, 0 }
  0x12   : > { %s2250_s28 = smov [#allocation2]   ;;  %s2251_s4 = smov [#allocation5]  }
  0x13   : > { %p1937_p12 = pneg %p2334_p10  ;;  %s165_s29 = sshll.u32 %s2250_s28, 4  ;;  %s166_s29 = int_to_ptr.vmem [resolvable:$true] %s165_s29 }
  0x14   : > { %s180_s5 = sshll.u32 %s2251_s4, 4  ;;  %s2115_s6 = scalar_lea.vmem %s166_s29, 4224  ;;  %s181_s5 = int_to_ptr.vmem [resolvable:$true] %s180_s5 }
  0x15   : > { %p2346_p13 = pnand %p2338_p11, %p1937_p12  ;;  %p2116_p1 = scmp.ne.s32.totalorder %s166_s29, %s2115_s6 }
  0x16   : > { %p2123_p5 = scmp.lt.s32.totalorder %s166_s29, %s166_s29  ;;  %p2124_p6 = scmp.lt.s32.totalorder %s2115_s6, %s2115_s6 }
  0x17   : > { %p2106_p0 = pneg %p2346_p13 }
  0x18   : > { %p2125_p7 = por %p2124_p6, %p2123_p5 }
  0x19   : > { %p2118_p2 = pnand %p2116_p1, %p2106_p0 }
  0x1b   : > { %p2119_p3 = pneg %p2118_p2 }
  0x1d   : > { %p2126_p9 = pnand %p2125_p7, %p2119_p3 }
  0x1f   : > { %2129 = shalt.err (!%p2126_p9)
}
  0x20   : > { %s2252_s7 = smov 64   ;;  %s2253_s8 = smov 4  }
  0x21   : > { %1940 = dma.hbm_to_vmem [thread:$0]  (!%p2346_p13), %s2588_s0, 4224, %s166_s29, [#allocation3], %s2252_s7, %s2252_s7, %s2253_s8  }
  0x22   : > { %s2141_s11 = scalar_lea.vmem %s181_s5, 9216  ;;  %p2149_p8 = scmp.lt.s32.totalorder %s181_s5, %s181_s5 }
  0x23   : > { %p2142_p12 = scmp.ne.s32.totalorder %s181_s5, %s2141_s11  ;;  %p2150_p4 = scmp.lt.s32.totalorder %s2141_s11, %s2141_s11 }
  0x25   : > { %p2144_p1 = pnand %p2142_p12, %p2106_p0  ;;  %p2151_p5 = por %p2150_p4, %p2149_p8 }
  0x27   : > { %p2145_p2 = pneg %p2144_p1 }
  0x29   : > { %p2152_p3 = pnand %p2151_p5, %p2145_p2 }
  0x2b   : > { %2155 = shalt.err (!%p2152_p3)
}
  0x2c   : > { %1943 = dma.hbm_to_vmem [thread:$0]  (!%p2346_p13), %s2589_s1, 9216, %s181_s5, [#allocation6], %s2252_s7, %s2252_s7, %s2253_s8  }
  0x2d   : > { %202 = sbr.rel (%p2334_p10) target bundleno = 434 (0x1b2), region = 32 }
  0x32   : > { %2211 = dma.done.wait (%p2338_p11), [#allocation3], 4224  }
  0x33   : > { %2213 = vsyncadd (%p2338_p11), [#allocation3], 4294963072 }
  0x34   : > { %2215 = dma.done.wait (%p2338_p11), [#allocation6], 9216  }
  0x35   : > { %2217 = vsyncadd (%p2338_p11), [#allocation6], 4294958080  ;;  %s225_s21 = sand.u32 1, %s2228_s13   ;;  %s1539_s23 = sshll.u32 %s2236_s15, 3  ;;  %v2387_v0 = vld [vmem:[%s2590_s2] ss:$0 sm:$0xff] }
  0x36   : > { %s2382_s26 = sshll.u32 %s225_s21, 6  ;;  %s2390_s4 = smov 0  }
  0x37   : > { %s227_s30 = scalar_lea.vmem [#allocation7], %s2382_s26 }
  0x38 LB: >> { %v2017_v1 = vld [vmem:[#allocation5 + $0x78] sm:$0xff]   ;;  %v2254_v2 = vmov 0.0   ;;  %v2019_v4 = vld [vmem:[#allocation5 + $0x70] sm:$0xff]   ;;  %vm2255_vm0 = vmmov 0   ;;  %v2021_v6 = vld [vmem:[#allocation5 + $0x68] sm:$0xff]   ;;  %s241_s27 = sadd.s32 %s2248_s4, %s1539_s23  ;;  %vm516_vm2 = vcmask 1044480   ;;  %s2248_s4 = sphi %s2390_s4, %s240_s4  }
  0x39   : >> { %1747 = vmatprep.subr.bf16.mxu0 %v2254_v2  ;;  %1767 = vmatprep.subr.bf16.mxu1 %v2254_v2  ;;  %v2018_v3 = vld [vmem:[#allocation5 + $0x38] sm:$0xff]   ;;  %v2020_v5 = vld [vmem:[#allocation5 + $0x30] sm:$0xff]   ;;  %v2022_v7 = vld [vmem:[#allocation5 + $0x28] sm:$0xff]   ;;  %s1655_s5 = smul.u32 12, %s241_s27  ;;  %vm290_vm1 = vsmask.f32 6400 }
  0x3a   : >> { %1748 = vmatpush3.bf16.msra.mxu0 %v2017_v1  ;;  %1763 = vmatprep.mubr.msk.bf16.mxu0 %vm2255_vm0, %v2254_v2  ;;  %v2023_v8 = vld [vmem:[#allocation5 + $0x60] sm:$0xff]   ;;  %v2025_v10 = vld [vmem:[#allocation5 + $0x58] sm:$0xff]   ;;  %v2027_v14 = vld [vmem:[#allocation5 + $0x50] sm:$0xff]   ;;  %s1658_s7 = sshll.u32 %s2248_s4, 3  ;;  %s240_s4 = sadd.s32 1, %s2248_s4  }
  0x3b   : >> { %1768 = vmatpush3.bf16.msra.mxu1 %v2018_v3  ;;  %1749 = vmatprep.subr.bf16.mxu0 %v2254_v2  ;;  %v2024_v9 = vld [vmem:[#allocation5 + $0x20] sm:$0xff]   ;;  %v2026_v11 = vld [vmem:[#allocation5 + $0x18] sm:$0xff]   ;;  %s2412_s6 = scalar_lea.vmem [#allocation2], %s1655_s5  ;;  %v2028_v17 = vld [vmem:[#allocation5 + $0x10] sm:$0xff]   ;;  %s1384_s8 = scalar_lea.vmem %s227_s30, %s1658_s7 [#allocation7] }
  0x3c   : >> { %1769 = vmatprep.subr.bf16.mxu1 %v2254_v2  ;;  %1783 = vmatprep.mubr.msk.bf16.mxu1 %vm2255_vm0, %v2254_v2  ;;  %v2415_v12 = vld [vmem:[%s2412_s6 + $0x4] sm:$0xf]  ;;  %v263_v13 = vld [vmem:[%s2412_s6] sm:$0xe]  ;;  %v2029_v22 = vld [vmem:[#allocation5 + $0x48] sm:$0xff]   ;;  %p237_p4 = scmp.ge.s32.totalorder %s240_s4, 8  }
  0x3d   : >> { %v1541_v15 = vcombine.low %v263_v13, %v2415_v12  ;;  %v2034_v16 = vld [vmem:[%s2412_s6 + $0x8] ss:$0 sps:$4 sm:$0x33]   ;;  %v2030_v27 = vld [vmem:[#allocation5 + $0x8] sm:$0xff]   ;;  %v245_v32 = vld [vmem:[%s2412_s6] sm:$0xf] }
  0x3e   : >> { %1750 = vmatpush3.bf16.msra.mxu0 %v2019_v4  ;;  %v300_v20 = vshrl.u32 %v2034_v16, 16  ;;  %v303_v21 = vshll.u32 %v2034_v16, 16  ;;  %v2031_v28 = vld [vmem:[#allocation5 + $0x40] sm:$0xff]   ;;  %v1551_v34 = vcombine.low %v245_v32, %v2415_v12  ;;  %v2036_v35 = vld [vmem:[#allocation5 + $0xb8] sm:$0xff]   ;;  %v2038_v37 = vld [vmem:[#allocation5 + $0xb0] sm:$0xff]   ;;  %s1660_s9 = sshll.u32 (%p237_p4), %s2236_s15, 10 }
  0x3f   : >> { %1770 = vmatpush3.bf16.msra.mxu1 %v2020_v5  ;;  %1751 = vmatprep.subr.bf16.mxu0 %v2254_v2  ;;  %v292_v18 = vshrl.u32 %v1541_v15, 16  ;;  %v295_v19 = vshll.u32 %v1541_v15, 16  ;;  %v2032_v29 = vld [vmem:[#allocation5] sm:$0xff]   ;;  %v2037_v36 = vld [vmem:[#allocation5 + $0xf8] sm:$0xff]   ;;  %v2039_v38 = vld [vmem:[#allocation5 + $0xf0] sm:$0xff]   ;;  %s2535_s18 = scalar_lea.hbm (%p237_p4), %s2591_s3, %s1660_s9  ;;  %s1405_s19 = sshll.u32 (%p237_p4), %s227_s30, 4  ;;  %s2539_s19 = int_to_ptr.vmem [resolvable:$true] %s1405_s19 }
  0x40   : >> { %1771 = vmatprep.subr.bf16.mxu1 %v2254_v2  ;;  %v302_v25 = vrot.slane %v300_v20, 1  ;;  %v305_v26 = vrot.slane %v303_v21, 2  ;;  %v2040_v39 = vld [vmem:[#allocation5 + $0xa8] sm:$0xff]   ;;  %v2042_v41 = vld [vmem:[#allocation5 + $0xa0] sm:$0xff]   ;;  %v2044_v43 = vld [vmem:[#allocation5 + $0x98] sm:$0xff]   ;;  %s2543_s28 = scalar_lea.sflag (%p237_p4), [#allocation4], %s225_s21 }
  0x41   : >> { %v294_v23 = vrot.slane %v292_v18, 1  ;;  %v297_v24 = vrot.slane %v295_v19, 2  ;;  %v2041_v40 = vld [vmem:[#allocation5 + $0xe8] sm:$0xff]   ;;  %v2043_v42 = vld [vmem:[#allocation5 + $0xe0] sm:$0xff]   ;;  %v2045_v44 = vld [vmem:[#allocation5 + $0xd8] sm:$0xff]   ;;  %s2156_s23 = scalar_lea.vmem (%p237_p4), %s2539_s19, 1024 }
  0x42   : >> { %1752 = vmatpush3.bf16.msra.mxu0 %v2021_v6  ;;  %v306_v31 = vor.u32 %v305_v26, %v302_v25  ;;  %v2046_v45 = vld [vmem:[#allocation5 + $0x90] sm:$0xff]   ;;  %v491_v47 = vld [vmem:[%s2412_s6] sm:$0x8]  ;;  %v2048_v48 = vld [vmem:[#allocation5 + $0x88] sm:$0xff]   ;;  %p2157_p8 = scmp.ne.s32.totalorder (%p237_p4), %s2539_s19, %s2156_s23  ;;  %p2598_p10 = scmp.ne.s32.totalorder (%p237_p4), %s2593_s22, 0 }
  0x43   : >> { %1772 = vmatpush3.bf16.msra.mxu1 %v2022_v7  ;;  %1753 = vmatprep.subr.bf16.mxu0 %v2254_v2  ;;  %v298_v30 = vor.u32 %v297_v24, %v294_v23  ;;  %v2047_v46 = vld [vmem:[#allocation5 + $0xd0] sm:$0xff]   ;;  %v1560_v49 = vcombine.low %v491_v47, %v2415_v12  ;;  %v2053_v50 = vld [vmem:[%s2412_s6 + $0x8] ss:$0 sps:$4 sm:$0x77]   ;;  %v2049_v51 = vld [vmem:[#allocation5 + $0xc8] sm:$0xff]   ;;  %s2256_s15 = smov (%p237_p4), [#allocation7]  }
  0x44   : >> { %1773 = vmatprep.subr.bf16.mxu1 %v2254_v2  ;;  %v2050_v52 = vld [vmem:[#allocation5 + $0x80] sm:$0xff]   ;;  %v518_v54 = vrot.slane %v2053_v50, 3  ;;  %v2054_v56 = vld [vmem:[#allocation5 + $0x138] sm:$0xff]   ;;  %v2057_v60 = vld [vmem:[#allocation5 + $0x130] sm:$0xff]   ;;  %p2158_p11 = pnand (%p237_p4), %p2157_p8, %p2598_p10  ;;  %s2160_s29 = sshll.u32 (%p237_p4), %s2256_s15, 4  ;;  %s2161_s29 = int_to_ptr.vmem [resolvable:$false] %s2160_s29 }
  0x45   : >> { %v307_v33 = vsel %vm290_vm1, %v298_v30, %v306_v31  ;;  %v517_v53 = vrot.slane %v1560_v49, 3  ;;  %v2051_v55 = vld [vmem:[#allocation5 + $0xc0] sm:$0xff]   ;;  %v2056_v59 = vld [vmem:[#allocation5 + $0x178] sm:$0xff]   ;;  %v2058_v61 = vld [vmem:[#allocation5 + $0x170] sm:$0xff]   ;;  %s2162_s4 = scalar_lea.vmem (%p237_p4), %s2161_s29, 2048  ;;  %p2163_p0 = scmp.lt.s32.totalorder (%p237_p4), %s2539_s19, %s2161_s29 }
  0x46   : >> { %1754 = vmatpush3.bf16.msra.mxu0 %v2023_v8  ;;  %v2055_v58 = vld [vmem:[%s2412_s6 + $0x24] sm:$0xff]   ;;  %v2059_v62 = vld [vmem:[#allocation5 + $0x128] sm:$0xff]   ;;  %v2072_v8 = vld [vmem:[%s2412_s6 + $0x2c] ss:$0 sps:$4 sm:$0x33]   ;;  %p2159_p13 = pneg (%p237_p4), %p2158_p11  ;;  %p2164_p6 = scmp.lt.s32.totalorder (%p237_p4), %s2162_s4, %s2156_s23 }
  0x47   : >> { %1774 = vmatpush3.bf16.msra.mxu1 %v2024_v9  ;;  %1755 = vmatprep.subr.bf16.mxu0 %v2254_v2  ;;  %v519_v57 = vsel %vm516_vm2, %v517_v53, %v518_v54  ;;  %v2060_v63 = vld [vmem:[#allocation5 + $0x168] sm:$0xff]   ;;  %v1582_v1 = vld [vmem:[%s2412_s6 + $0x24] sm:$0xe]  ;;  %v1583_v3 = vld [vmem:[%s2412_s6 + $0x28] sm:$0xf]  ;;  %v769_v13 = vshrl.u32 %v2072_v8, 16 }
  0x48   : >> { %1775 = vmatprep.subr.bf16.mxu1 %v2254_v2  ;;  %v2061_v4 = vld [vmem:[#allocation5 + $0x120] sm:$0xff]   ;;  %v1585_v6 = vcombine.low %v1582_v1, %v1583_v3  ;;  %v2063_v7 = vld [vmem:[#allocation5 + $0x118] sm:$0xff]   ;;  %v2066_v15 = vld [vmem:[#allocation5 + $0x150] sm:$0xff]   ;;  %p2165_p7 = por (%p237_p4), %p2164_p6, %p2163_p0 }
  0x49   : >> { %v2062_v5 = vld [vmem:[#allocation5 + $0x160] sm:$0xff]   ;;  %v2064_v9 = vld [vmem:[#allocation5 + $0x158] sm:$0xff]   ;;  %v771_v20 = vrot.slane %v769_v13, 1  ;;  %v2085_v47 = vld [vmem:[#allocation5 + $0x190] sm:$0xff]  }
  0x4a   : >> { %1756 = vmatpush3.bf16.msra.mxu0 %v2025_v10  ;;  %v2065_v10 = vld [vmem:[#allocation5 + $0x110] sm:$0xff]   ;;  %v764_v12 = vshll.u32 %v1585_v6, 16  ;;  %v1595_v16 = vld [vmem:[%s2412_s6 + $0x24] sm:$0x8]  ;;  %v2069_v25 = vld [vmem:[#allocation5 + $0x100] sm:$0xff]   ;;  %p2166_p9 = pnand (%p237_p4), %p2165_p7, %p2159_p13 }
  0x4b   : >> { %1776 = vmatpush3.bf16.msra.mxu1 %v2026_v11  ;;  %1757 = vmatprep.subr.bf16.mxu0 %v2254_v2  ;;  %v761_v11 = vshrl.u32 %v1585_v6, 16  ;;  %v1597_v23 = vcombine.low %v1595_v16, %v1583_v3  ;;  %v2075_v24 = vld [vmem:[%s2412_s6 + $0x2c] ss:$0 sps:$4 sm:$0x77]   ;;  %v2073_v32 = vld [vmem:[#allocation5 + $0x1b8] sm:$0xff]   ;;  %v2087_v53 = vld [vmem:[#allocation5 + $0x188] sm:$0xff]  }
  0x4c   : >> { %1777 = vmatprep.subr.bf16.mxu1 %v2254_v2  ;;  %v766_v19 = vrot.slane %v764_v12, 2  ;;  %v895_v30 = vrot.slane %v2075_v24, 3  ;;  %v2088_v54 = vld [vmem:[#allocation5 + $0x1c8] sm:$0xff]   ;;  %v2092_v1 = vld [vmem:[#allocation5 + $0x238] sm:$0xff]   ;;  %v2097_v6 = vld [vmem:[#allocation5 + $0x220] sm:$0xff]  }
  0x4d   : >> { %v763_v18 = vrot.slane %v761_v11, 1  ;;  %v2103_v12 = vld [vmem:[%s2412_s6 + $0x50] ss:$0 sps:$4 sm:$0x77]   ;;  %v2101_v13 = vld [vmem:[#allocation5 + $0x200] sm:$0xff]  }
  0x4e   : >> { %1758 = vmatpush3.bf16.msra.mxu0 %v2027_v14  ;;  %v772_v14 = vshll.u32 %v2072_v8, 16  ;;  %v2099_v8 = vld [vmem:[#allocation5 + $0x210] sm:$0xff]  }
  0x4f   : >> { %1778 = vmatpush3.bf16.msra.mxu1 %v2028_v17  ;;  %1759 = vmatprep.subr.bf16.mxu0 %v2254_v2  ;;  %v2067_v17 = vld [vmem:[#allocation5 + $0x108] sm:$0xff]   ;;  %v767_v26 = vor.u32 %v766_v19, %v763_v18 }
  0x50   : >> { %1779 = vmatprep.subr.bf16.mxu1 %v2254_v2  ;;  %v774_v21 = vrot.slane %v772_v14, 2 }
  0x52   : >> { %1760 = vmatpush3.bf16.msra.mxu0 %v2029_v22  ;;  %v2068_v22 = vld [vmem:[#allocation5 + $0x148] sm:$0xff]  }
  0x53   : >> { %1780 = vmatpush3.bf16.msra.mxu1 %v2030_v27  ;;  %1761 = vmatprep.subr.bf16.mxu0 %v2254_v2  ;;  %v775_v27 = vor.u32 %v774_v21, %v771_v20 }
  0x54   : >> { %1781 = vmatprep.subr.bf16.mxu1 %v2254_v2 }
  0x55   : >> { %v776_v31 = vsel %vm290_vm1, %v767_v26, %v775_v27 }
  0x56   : >> { %1762 = vmatpush3.bf16.msra.mxu0 %v2031_v28  ;;  %v2070_v28 = vld [vmem:[#allocation5 + $0x140] sm:$0xff]  }
  0x57   : >> { %1782 = vmatpush3.bf16.msra.mxu1 %v2032_v29  ;;  %1787 = vmatprep.subr.bf16.mxu0 %v2254_v2  ;;  %v894_v29 = vrot.slane %v1597_v23, 3 }
  0x58   : >> { %1807 = vmatprep.subr.bf16.mxu1 %v2254_v2 }
  0x59   : >> { %1764 = vmatmul.mubr.bf16.vlgmr.msra.gmra.mxu0 %v307_v33  ;;  %v896_v33 = vsel %vm516_vm2, %v894_v29, %v895_v30 }
  0x5a   : >> { %1784 = vmatmul.mubr.bf16.vlgmr.msra.gmra.mxu1 %v1551_v34  ;;  %1788 = vmatpush3.bf16.msra.mxu0 %v2036_v35  ;;  %v2076_v34 = vld [vmem:[#allocation5 + $0x1f8] sm:$0xff]   ;;  %v2077_v35 = vld [vmem:[#allocation5 + $0x1b0] sm:$0xff]  }
  0x5b   : >> { %1808 = vmatpush3.bf16.msra.mxu1 %v2037_v36  ;;  %1789 = vmatprep.subr.bf16.mxu0 %v2254_v2  ;;  %v2078_v36 = vld [vmem:[#allocation5 + $0x1f0] sm:$0xff]  }
  0x5c   : >> { %1809 = vmatprep.subr.bf16.mxu1 %v2254_v2  ;;  %1803 = vmatprep.mubr.msk.bf16.mxu0 %vm2255_vm0, %v2254_v2 }
  0x5d   : >> { %1823 = vmatprep.mubr.msk.bf16.mxu1 %vm2255_vm0, %v2254_v2 }
  0x5e   : >> { %1790 = vmatpush3.bf16.msra.mxu0 %v2038_v37  ;;  %v2079_v37 = vld [vmem:[#allocation5 + $0x1a8] sm:$0xff]  }
  0x5f   : >> { %1810 = vmatpush3.bf16.msra.mxu1 %v2039_v38  ;;  %1791 = vmatprep.subr.bf16.mxu0 %v2254_v2  ;;  %v2080_v38 = vld [vmem:[#allocation5 + $0x1e8] sm:$0xff]  }
  0x60   : >> { %1811 = vmatprep.subr.bf16.mxu1 %v2254_v2 }
  0x62   : >> { %1792 = vmatpush3.bf16.msra.mxu0 %v2040_v39  ;;  %v2081_v39 = vld [vmem:[#allocation5 + $0x1a0] sm:$0xff]  }
  0x63   : >> { %1812 = vmatpush3.bf16.msra.mxu1 %v2041_v40  ;;  %1793 = vmatprep.subr.bf16.mxu0 %v2254_v2  ;;  %v2082_v40 = vld [vmem:[#allocation5 + $0x1e0] sm:$0xff]  }
  0x64   : >> { %1813 = vmatprep.subr.bf16.mxu1 %v2254_v2 }
  0x66   : >> { %1794 = vmatpush3.bf16.msra.mxu0 %v2042_v41  ;;  %v1619_v41 = vld [vmem:[%s2412_s6 + $0x48] sm:$0xe] }
  0x67   : >> { %1814 = vmatpush3.bf16.msra.mxu1 %v2043_v42  ;;  %1795 = vmatprep.subr.bf16.mxu0 %v2254_v2  ;;  %v2495_v42 = vld [vmem:[%s2412_s6 + $0x4c] sm:$0xf] }
  0x68   : >> { %1815 = vmatprep.subr.bf16.mxu1 %v2254_v2 }
  0x6a   : >> { %1796 = vmatpush3.bf16.msra.mxu0 %v2044_v43  ;;  %v2083_v43 = vld [vmem:[#allocation5 + $0x198] sm:$0xff]  }
  0x6b   : >> { %1816 = vmatpush3.bf16.msra.mxu1 %v2045_v44  ;;  %1797 = vmatprep.subr.bf16.mxu0 %v2254_v2  ;;  %v2084_v44 = vld [vmem:[#allocation5 + $0x1d8] sm:$0xff]  }
  0x6c   : >> { %1817 = vmatprep.subr.bf16.mxu1 %v2254_v2 }
  0x6e   : >> { %1798 = vmatpush3.bf16.msra.mxu0 %v2046_v45  ;;  %v1622_v45 = vcombine.low %v1619_v41, %v2495_v42 }
  0x6f   : >> { %1818 = vmatpush3.bf16.msra.mxu1 %v2047_v46  ;;  %1799 = vmatprep.subr.bf16.mxu0 %v2254_v2  ;;  %v2094_v46 = vld [vmem:[%s2412_s6 + $0x50] ss:$0 sps:$4 sm:$0x33]  }
  0x70   : >> { %1819 = vmatprep.subr.bf16.mxu1 %v2254_v2  ;;  %v1138_v49 = vshrl.u32 %v1622_v45, 16  ;;  %v1141_v50 = vshll.u32 %v1622_v45, 16 }
  0x72   : >> { %1800 = vmatpush3.bf16.msra.mxu0 %v2048_v48  ;;  %v2086_v48 = vld [vmem:[#allocation5 + $0x1d0] sm:$0xff]  }
  0x73   : >> { %1820 = vmatpush3.bf16.msra.mxu1 %v2049_v51  ;;  %1801 = vmatprep.subr.bf16.mxu0 %v2254_v2  ;;  %v1146_v51 = vshrl.u32 %v2094_v46, 16 }
  0x74   : >> { %1821 = vmatprep.subr.bf16.mxu1 %v2254_v2 }
  0x76   : >> { %1802 = vmatpush3.bf16.msra.mxu0 %v2050_v52  ;;  %v1149_v52 = vshll.u32 %v2094_v46, 16 }
  0x77   : >> { %1822 = vmatpush3.bf16.msra.mxu1 %v2051_v55  ;;  %1827 = vmatprep.subr.bf16.mxu0 %v2254_v2  ;;  %v1140_v55 = vrot.slane %v1138_v49, 1 }
  0x78   : >> { %1847 = vmatprep.subr.bf16.mxu1 %v2254_v2 }
  0x79   : >> { %1804 = vmatmul.mubr.bf16.vlgmr.msra.gmra.mxu0 %v519_v57  ;;  %v1148_v57 = vrot.slane %v1146_v51, 1 }
  0x7a   : >> { %1828 = vmatpush3.bf16.msra.mxu0 %v2054_v56  ;;  %1824 = vmatmul.mubr.bf16.vlgmr.msra.gmra.mxu1 %v2055_v58  ;;  %v1143_v56 = vrot.slane %v1141_v50, 2  ;;  %v1151_v58 = vrot.slane %v1149_v52, 2 }
  0x7b   : >> { %1848 = vmatpush3.bf16.msra.mxu1 %v2056_v59  ;;  %1829 = vmatprep.subr.bf16.mxu0 %v2254_v2  ;;  %v2089_v59 = vld [vmem:[#allocation5 + $0x180] sm:$0xff]  }
  0x7c   : >> { %1849 = vmatprep.subr.bf16.mxu1 %v2254_v2  ;;  %1843 = vmatprep.mubr.msk.bf16.mxu0 %vm2255_vm0, %v2254_v2 }
  0x7d   : >> { %1863 = vmatprep.mubr.msk.bf16.mxu1 %vm2255_vm0, %v2254_v2 }
  0x7e   : >> { %1830 = vmatpush3.bf16.msra.mxu0 %v2057_v60  ;;  %v2090_v60 = vld [vmem:[#allocation5 + $0x1c0] sm:$0xff]  }
  0x7f   : >> { %1850 = vmatpush3.bf16.msra.mxu1 %v2058_v61  ;;  %1831 = vmatprep.subr.bf16.mxu0 %v2254_v2  ;;  %v1144_v61 = vor.u32 %v1143_v56, %v1140_v55 }
  0x80   : >> { %1851 = vmatprep.subr.bf16.mxu1 %v2254_v2 }
  0x82   : >> { %1832 = vmatpush3.bf16.msra.mxu0 %v2059_v62  ;;  %v1152_v62 = vor.u32 %v1151_v58, %v1148_v57 }
  0x83   : >> { %1852 = vmatpush3.bf16.msra.mxu1 %v2060_v63  ;;  %1833 = vmatprep.subr.bf16.mxu0 %v2254_v2  ;;  %v2091_v63 = vld [vmem:[%s2412_s6 + $0x48] sm:$0xff]  }
  0x84   : >> { %1853 = vmatprep.subr.bf16.mxu1 %v2254_v2  ;;  %v1153_v3 = vsel %vm290_vm1, %v1144_v61, %v1152_v62 }
  0x86   : >> { %1834 = vmatpush3.bf16.msra.mxu0 %v2061_v4  ;;  %v2095_v4 = vld [vmem:[#allocation5 + $0x230] sm:$0xff]  }
  0x87   : >> { %1854 = vmatpush3.bf16.msra.mxu1 %v2062_v5  ;;  %1835 = vmatprep.subr.bf16.mxu0 %v2254_v2  ;;  %v2096_v5 = vld [vmem:[#allocation5 + $0x228] sm:$0xff]  }
  0x88   : >> { %1855 = vmatprep.subr.bf16.mxu1 %v2254_v2 }
  0x8a   : >> { %1836 = vmatpush3.bf16.msra.mxu0 %v2063_v7  ;;  %v2098_v7 = vld [vmem:[#allocation5 + $0x218] sm:$0xff]  }
  0x8b   : >> { %1856 = vmatpush3.bf16.msra.mxu1 %v2064_v9  ;;  %1837 = vmatprep.subr.bf16.mxu0 %v2254_v2  ;;  %v1632_v9 = vld [vmem:[%s2412_s6 + $0x48] sm:$0x8] }
  0x8c   : >> { %1857 = vmatprep.subr.bf16.mxu1 %v2254_v2  ;;  %v1634_v11 = vcombine.low %v1632_v9, %v2495_v42 }
  0x8e   : >> { %1838 = vmatpush3.bf16.msra.mxu0 %v2065_v10  ;;  %v2100_v10 = vld [vmem:[#allocation5 + $0x208] sm:$0xff]   ;;  %v1271_v14 = vrot.slane %v1634_v11, 3 }
  0x8f   : >> { %1858 = vmatpush3.bf16.msra.mxu1 %v2066_v15  ;;  %1839 = vmatprep.subr.bf16.mxu0 %v2254_v2  ;;  %v1272_v15 = vrot.slane %v2103_v12, 3 }
  0x90   : >> { %1859 = vmatprep.subr.bf16.mxu1 %v2254_v2 }
  0x91   : >> { %v1273_v16 = vsel %vm516_vm2, %v1271_v14, %v1272_v15 }
  0x92   : >> { %1840 = vmatpush3.bf16.msra.mxu0 %v2067_v17 }
  0x93   : >> { %1860 = vmatpush3.bf16.msra.mxu1 %v2068_v22  ;;  %1841 = vmatprep.subr.bf16.mxu0 %v2254_v2 }
  0x94   : >> { %1861 = vmatprep.subr.bf16.mxu1 %v2254_v2 }
  0x96   : >> { %1842 = vmatpush3.bf16.msra.mxu0 %v2069_v25 }
  0x97   : >> { %1862 = vmatpush3.bf16.msra.mxu1 %v2070_v28  ;;  %1867 = vmatprep.subr.bf16.mxu0 %v2254_v2 }
  0x98   : >> { %1887 = vmatprep.subr.bf16.mxu1 %v2254_v2 }
  0x99   : >> { %1844 = vmatmul.mubr.bf16.vlgmr.msra.gmra.mxu0 %v776_v31 }
  0x9a   : >> { %1868 = vmatpush3.bf16.msra.mxu0 %v2073_v32  ;;  %1864 = vmatmul.mubr.bf16.vlgmr.msra.gmra.mxu1 %v896_v33 }
  0x9b   : >> { %1888 = vmatpush3.bf16.msra.mxu1 %v2076_v34  ;;  %1869 = vmatprep.subr.bf16.mxu0 %v2254_v2 }
  0x9c   : >> { %1889 = vmatprep.subr.bf16.mxu1 %v2254_v2  ;;  %1883 = vmatprep.mubr.msk.bf16.mxu0 %vm2255_vm0, %v2254_v2 }
  0x9d   : >> { %1903 = vmatprep.mubr.msk.bf16.mxu1 %vm2255_vm0, %v2254_v2 }
  0x9e   : >> { %1870 = vmatpush3.bf16.msra.mxu0 %v2077_v35 }
  0x9f   : >> { %1890 = vmatpush3.bf16.msra.mxu1 %v2078_v36  ;;  %1871 = vmatprep.subr.bf16.mxu0 %v2254_v2 }
  0xa0   : >> { %1891 = vmatprep.subr.bf16.mxu1 %v2254_v2 }
  0xa2   : >> { %1872 = vmatpush3.bf16.msra.mxu0 %v2079_v37 }
  0xa3   : >> { %1892 = vmatpush3.bf16.msra.mxu1 %v2080_v38  ;;  %1873 = vmatprep.subr.bf16.mxu0 %v2254_v2 }
  0xa4   : >> { %1893 = vmatprep.subr.bf16.mxu1 %v2254_v2 }
  0xa6   : >> { %1874 = vmatpush3.bf16.msra.mxu0 %v2081_v39 }
  0xa7   : >> { %1894 = vmatpush3.bf16.msra.mxu1 %v2082_v40  ;;  %1875 = vmatprep.subr.bf16.mxu0 %v2254_v2 }
  0xa8   : >> { %1895 = vmatprep.subr.bf16.mxu1 %v2254_v2 }
  0xaa   : >> { %1876 = vmatpush3.bf16.msra.mxu0 %v2083_v43 }
  0xab   : >> { %1896 = vmatpush3.bf16.msra.mxu1 %v2084_v44  ;;  %1877 = vmatprep.subr.bf16.mxu0 %v2254_v2 }
  0xac   : >> { %1897 = vmatprep.subr.bf16.mxu1 %v2254_v2 }
  0xae   : >> { %1878 = vmatpush3.bf16.msra.mxu0 %v2085_v47 }
  0xaf   : >> { %1898 = vmatpush3.bf16.msra.mxu1 %v2086_v48  ;;  %1879 = vmatprep.subr.bf16.mxu0 %v2254_v2 }
  0xb0   : >> { %1899 = vmatprep.subr.bf16.mxu1 %v2254_v2 }
  0xb2   : >> { %1880 = vmatpush3.bf16.msra.mxu0 %v2087_v53 }
  0xb3   : >> { %1900 = vmatpush3.bf16.msra.mxu1 %v2088_v54  ;;  %1881 = vmatprep.subr.bf16.mxu0 %v2254_v2 }
  0xb4   : >> { %1901 = vmatprep.subr.bf16.mxu1 %v2254_v2 }
  0xb6   : >> { %1882 = vmatpush3.bf16.msra.mxu0 %v2089_v59 }
  0xb7   : >> { %1902 = vmatpush3.bf16.msra.mxu1 %v2090_v60  ;;  %1907 = vmatprep.subr.bf16.mxu0 %v2254_v2 }
  0xb9   : >> { %1884 = vmatmul.mubr.bf16.vlgmr.msra.gmra.mxu0 %v2091_v63 }
  0xba   : >> { %1908 = vmatpush3.bf16.msra.mxu0 %v2092_v1  ;;  %1904 = vmatmul.mubr.bf16.vlgmr.msra.gmra.mxu1 %v1153_v3 }
  0xbb   : >> { %1909 = vmatprep.subr.bf16.mxu0 %v2254_v2  ;;  %1923 = vmatprep.mubr.msk.bf16.mxu0 %vm2255_vm0, %v2254_v2 }
  0xbe   : >> { %1910 = vmatpush3.bf16.msra.mxu0 %v2095_v4 }
  0xbf   : >> { %1911 = vmatprep.subr.bf16.mxu0 %v2254_v2 }
  0xc2   : >> { %1912 = vmatpush3.bf16.msra.mxu0 %v2096_v5 }
  0xc3   : >> { %1913 = vmatprep.subr.bf16.mxu0 %v2254_v2 }
  0xc6   : >> { %1914 = vmatpush3.bf16.msra.mxu0 %v2097_v6 }
  0xc7   : >> { %1915 = vmatprep.subr.bf16.mxu0 %v2254_v2 }
  0xca   : >> { %1916 = vmatpush3.bf16.msra.mxu0 %v2098_v7 }
  0xcb   : >> { %1917 = vmatprep.subr.bf16.mxu0 %v2254_v2 }
  0xce   : >> { %1918 = vmatpush3.bf16.msra.mxu0 %v2099_v8 }
  0xcf   : >> { %1919 = vmatprep.subr.bf16.mxu0 %v2254_v2 }
  0xd2   : >> { %1920 = vmatpush3.bf16.msra.mxu0 %v2100_v10 }
  0xd3   : >> { %1921 = vmatprep.subr.bf16.mxu0 %v2254_v2 }
  0xd6   : >> { %1922 = vmatpush3.bf16.msra.mxu0 %v2101_v13 }
  0xd9   : >> { %1924 = vmatmul.mubr.bf16.vlgmr.msra.gmra.mxu0 %v1273_v16 }
 0x119   : >> { %v391_v17 = vpop.f32.mrf.mxu0 }
 0x11a   : >> { %v484_v18 = vpop.f32.mrf.mxu1 }
 0x11b   : >> { %v485_v19 = vadd.f32 %v484_v18, %v391_v17  ;;  %v1765_v20 = vpop.f32.mrf.mxu0 }
 0x11c   : >> { %v1785_v21 = vpop.f32.mrf.mxu1 }
 0x11d   : >> { %v394_v22 = vpop.f32.mrf.mxu0 }
 0x11e   : >> { %v487_v23 = vpop.f32.mrf.mxu1 }
 0x11f   : >> { %v488_v24 = vadd.f32 %v487_v23, %v394_v22  ;;  %v1766_v25 = vpop.f32.mrf.mxu0 }
 0x120   : >> { %v1786_v26 = vpop.f32.mrf.mxu1 }
 0x139   : >> { %v603_v27 = vpop.f32.mrf.mxu0 }
 0x13a   : >> { %v610_v28 = vadd.f32 %v603_v27, %v485_v19  ;;  %v723_v29 = vpop.f32.mrf.mxu1 }
 0x13b   : >> { %v1805_v30 = vpop.f32.mrf.mxu0 }
 0x13c   : >> { %v730_v31 = vadd.f32 %v723_v29, %v610_v28  ;;  %v1825_v2 = vpop.f32.mrf.mxu1 }
 0x13d   : >> { %v606_v32 = vpop.f32.mrf.mxu0 }
 0x13e   : >> { %v611_v33 = vadd.f32 %v606_v32, %v488_v24  ;;  %v726_v34 = vpop.f32.mrf.mxu1 }
 0x13f   : >> { %v1806_v35 = vpop.f32.mrf.mxu0 }
 0x140   : >> { %v731_v36 = vadd.f32 %v726_v34, %v611_v33  ;;  %v1826_v37 = vpop.f32.mrf.mxu1 }
 0x159   : >> { %v860_v38 = vpop.f32.mrf.mxu0 }
 0x15a   : >> { %v980_v39 = vpop.f32.mrf.mxu1  ;;  %v867_v54 = vadd.f32 %v860_v38, %v730_v31 }
 0x15b   : >> { %v1845_v40 = vpop.f32.mrf.mxu0 }
 0x15c   : >> { %v1865_v41 = vpop.f32.mrf.mxu1  ;;  %v987_v56 = vadd.f32 %v980_v39, %v867_v54 }
 0x15d   : >> { %v863_v42 = vpop.f32.mrf.mxu0 }
 0x15e   : >> { %v983_v43 = vpop.f32.mrf.mxu1  ;;  %v868_v55 = vadd.f32 %v863_v42, %v731_v36 }
 0x15f   : >> { %v1846_v44 = vpop.f32.mrf.mxu0 }
 0x160   : >> { %v1866_v45 = vpop.f32.mrf.mxu1  ;;  %v988_v57 = vadd.f32 %v983_v43, %v868_v55 }
 0x179   : >> { %v1100_v46 = vpop.f32.mrf.mxu0 }
 0x17a   : >> { %v1237_v47 = vpop.f32.mrf.mxu1  ;;  %v1107_v58 = vadd.f32 %v1100_v46, %v987_v56 }
 0x17b   : >> { %v1885_v48 = vpop.f32.mrf.mxu0 }
 0x17c   : >> { %v1905_v49 = vpop.f32.mrf.mxu1  ;;  %v1244_v61 = vadd.f32 %v1237_v47, %v1107_v58 }
 0x17d   : >> { %v1103_v50 = vpop.f32.mrf.mxu0 }
 0x17e   : >> { %v1240_v51 = vpop.f32.mrf.mxu1  ;;  %v1108_v59 = vadd.f32 %v1103_v50, %v988_v57 }
 0x17f   : >> { %v1886_v52 = vpop.f32.mrf.mxu0 }
 0x180   : >> { %v1906_v53 = vpop.f32.mrf.mxu1  ;;  %v1245_v63 = vadd.f32 %v1240_v51, %v1108_v59 }
 0x199   : >> { %v1357_v60 = vpop.f32.mrf.mxu0 }
 0x19a   : >> { %v1364_v1 = vadd.f32 %v1357_v60, %v1244_v61 }
 0x19b   : >> { %v1925_v62 = vpop.f32.mrf.mxu0 }
 0x19c   : >> { %v1372_v6 = vadd.f32 %v2387_v0, %v1364_v1 }
 0x19d   : >> { %v1360_v3 = vpop.f32.mrf.mxu0 }
 0x19e   : >> { %v1365_v4 = vadd.f32 %v1360_v3, %v1245_v63 }
 0x19f   : >> { %v1926_v5 = vpop.f32.mrf.mxu0 }
 0x1a0   : >> { %v1373_v7 = vadd.f32 %v2387_v0, %v1365_v4  ;;  %239 = sbr.rel (!%p237_p4) target bundleno = 56 (0x38), region = 97 }
 0x1a2   : >> { %v1664_v8 = vpack.c.bf16 %v1373_v7, %v1372_v6 }
 0x1a4   : >> { %1665 = vst [vmem:[%s1384_s8] sm:$0xff] %v1664_v8  }
 0x1a5   : > { %2169 = shalt.err (!%p2166_p9)
}
 0x1a6   : > { %s2170_s21 = scalar_lea.hbm %s2535_s18, 1024  ;;  %s2174_s27 = scalar_lea.hbm %s2591_s3, 2048 }
 0x1a7   : > { %p2171_p12 = scmp.ne.s32.totalorder %s2535_s18, %s2170_s21  ;;  %p2175_p5 = scmp.lt.s32.totalorder %s2535_s18, %s2591_s3 }
 0x1a8   : > { %p2176_p3 = scmp.lt.s32.totalorder %s2174_s27, %s2170_s21 }
 0x1a9   : > { %p2172_p1 = pnand %p2171_p12, %p2598_p10 }
 0x1aa   : > { %p2177_p4 = por %p2176_p3, %p2175_p5 }
 0x1ab   : > { %p2173_p2 = pneg %p2172_p1 }
 0x1ad   : > { %p2178_p8 = pnand %p2177_p4, %p2173_p2 }
 0x1af   : > { %2181 = shalt.err (!%p2178_p8)
}
 0x1b0   : > { %s2257_s7 = smov 64   ;;  %s2258_s8 = smov 4  }
 0x1b1   : > { %1935 = dma.vmem_to_hbm [thread:$0]  (%p2598_p10), %s2539_s19, 1024, %s2535_s18, %s2543_s28, %s2257_s7, %s2257_s7, %s2258_s8  }
 0x1b2 PF: > { %p1952_p11 = scmp.ge.s32.totalorder %s2244_s17, 2  ;;  %s1420_s9 = sand.u32 1, %s2224_s12  }
 0x1b3   : > { %p2599_p13 = scmp.ne.s32.totalorder %s2594_s24, 0  ;;  %s1421_s10 = scalar_lea.sflag [#allocation4], %s1420_s9 }
 0x1b5   : > { %p1945_p0 = pnand %p1952_p11, %p2599_p13 }
 0x1b7   : > { %p1946_p6 = pneg %p1945_p0 }
 0x1b9   : > { %2219 = dma.done.wait (%p1946_p6), %s1421_s10, 1024  }
 0x1ba   : > { %2221 = vsyncadd (%p1946_p6), %s1421_s10, 4294966272  ;;  %s18_s17 = sadd.s32 1, %s2244_s17   ;;  %s2600_s12 = smov %s2228_s13 }
 0x1bb   : > { %p15_p7 = scmp.ge.s32.totalorder %s18_s17, 4   ;;  %s2601_s13 = smov %s2232_s14 }
 0x1bc   : > { %s2602_s14 = smov %s2332_s25  ;;  %s2603_s15 = smov %s2240_s16 }
 0x1bd   : > { %s2604_s16 = smov %s2606_s20  ;;  %17 = sbr.rel (!%p15_p7) target bundleno = 6 (0x6), region = 108 }
 0x1c2   :  { %1426 = vsyncpa [#allocation3], 1 }
 0x1c3   :  { %1428 = vsyncpa [#allocation3 + $0x1], 1 }
 0x1c4   :  { %1429 = vsyncpa [#allocation6], 1 }
 0x1c5   :  { %1430 = vsyncpa [#allocation4], 1 }
 0x1c6   :  { %1432 = vsyncpa [#allocation4 + $0x1], 1 }

</bundles_post_ra>
